<compile_context>
chip_gen: v7x
topology: tpu7x:2x2x1
jax: 0.10.0
libtpu: 0.0.40
codegen_flags: <defaults>
</compile_context>

<pallas_src>
import functools

import jax
import jax.numpy as jnp
from jax.experimental import pallas as pl
from jax.experimental.pallas import tpu as pltpu


def _tensor_gradient(x, mask_h, mask_v, w, l1):
    """TensorGradient of images flattened to rows of length H*W (roll + 0/1 masks)."""
    left = pltpu.roll(x, 1, axis=1) * mask_h     # x[..., j-1], zero at image column 0
    up = pltpu.roll(x, w, axis=1) * mask_v       # x[..., j-W], zero at image row 0
    gx = left - x
    gy = up - x
    if l1:
        return jnp.abs(gx) + jnp.abs(gy)
    return jnp.sqrt(gx * gx + gy * gy)


def _loss_anneal_kernel(mask_h_ref, mask_v_ref, pred_ref, gt_ref, out_ref, acc_ref,
                        *, w, gradient_l1):
    ci = pl.program_id(2)            # channel-tile index (sequential)
    ti = pl.program_id(3)            # burst-tile index within this parallel shard
    n_ci = pl.num_programs(2)
    n_ti = pl.num_programs(3)

    # Zero the per-core accumulator at the first sequential step of each (b, shard).
    @pl.when((ci == 0) & (ti == 0))
    def _():
        acc_ref[...] = jnp.zeros(acc_ref.shape, acc_ref.dtype)

    mask_h = mask_h_ref[...]                      # (1, H*W) f32, hoisted boundary masks
    mask_v = mask_v_ref[...]

    g = gt_ref[...].astype(jnp.float32)           # (c_blk, H*W); shared by all frames
    gg = _tensor_gradient(g, mask_h, mask_v, w, gradient_l1)

    # Loop over the burst frames of this slab: live f32 temporaries stay O(c_blk*H*W).
    @pl.loop(0, pred_ref.shape[0])
    def _(t):
        p = pred_ref[t].astype(jnp.float32)       # (c_blk, H*W)
        gp = _tensor_gradient(p, mask_h, mask_v, w, gradient_l1)
        diff = p - g
        # Per-element accumulation (better conditioned than one running scalar sum).
        acc_ref[...] += diff * diff + jnp.abs(gp - gg)

    # Single output write per (b, shard) group on the last sequential step.
    # TODO(synk): on v7x (VPU-bound) this final reduce could be offloaded to the idle
    # MXU via a ones-vector matmul.
    @pl.when((ci == n_ci - 1) & (ti == n_ti - 1))
    def _():
        out_ref[...] = jnp.zeros(out_ref.shape, out_ref.dtype) + jnp.sum(acc_ref[...])


def _default_vmem_limit_bytes():
    """~3/4 of per-core VMEM (128 MiB on v5e/v6e, 64 MiB on v7x), with a safe fallback."""
    cap = 64 * 1024 * 1024
    try:
        cap = int(getattr(pltpu.get_tpu_info(), "vmem_capacity_bytes", cap))
    except Exception:
        pass
    return max(16 * 1024 * 1024, min((cap * 3) // 4, 112 * 1024 * 1024))


def _pick_blocks(t, c, hw, itemsize, vmem_limit):
    """Choose (t_blk, c_blk) so slabs + f32 temporaries fit the per-chip VMEM budget."""
    # Channel tile: bounded by the ~8 live f32 (c_blk, H*W) temporaries per frame.
    # Keep the sublane dim legal: c_blk == C or a multiple of 8.
    temp_budget = vmem_limit // 4
    legal = [cb for cb in range(1, c + 1) if c % cb == 0 and (cb == c or cb % 8 == 0)]
    fitting = [cb for cb in legal if 8 * 4 * cb * hw <= temp_budget]
    c_blk = max(fitting) if fitting else min(legal)
    # Burst tile: bounded by the double-buffered pred input slab (~1/6 of the limit,
    # leaving room for the gt slab, masks, accumulator and the f32 temporaries).
    slab_budget = vmem_limit // 6
    fit_t = [tb for tb in range(1, t + 1)
             if t % tb == 0 and 2 * tb * c_blk * hw * itemsize <= slab_budget]
    t_blk = max(fit_t) if fit_t else 1
    # TODO(synk): if even (1, c_blk_min, H, W) overflows (very large H*W), also tile H
    # with a one-row halo for the vertical gradient.
    return t_blk, c_blk


def loss_anneal(global_step, pred_burst, ground_truth, *, alpha=0.9998, beta=100.0,
                gradient_l1=True, vmem_limit_bytes=None):
    """Pallas implementation of LossAnneal.forward.

    pred_burst:   (B, T, C, H, W)   (f32 or bf16 — keep bf16 in HBM on v5e)
    ground_truth: (B, C, H, W)
    returns:      scalar f32 loss
    """
    b, t, c, h, w = pred_burst.shape
    assert ground_truth.shape == (b, c, h, w), (pred_burst.shape, ground_truth.shape)
    hw = h * w

    if vmem_limit_bytes is None:
        vmem_limit_bytes = _default_vmem_limit_bytes()
    vmem_limit_bytes = int(vmem_limit_bytes)

    t_blk, c_blk = _pick_blocks(t, c, hw, pred_burst.dtype.itemsize, vmem_limit_bytes)
    n_ct = c // c_blk

    # Megacore (v7x): batch is the natural parallel axis; if B == 1, split the
    # burst-tile axis across the two TensorCores instead.
    if b == 1 and t_blk == t and t % 2 == 0:
        t_blk = t // 2
    n_tt = t // t_blk
    n_par = 2 if (b == 1 and n_tt % 2 == 0) else 1
    n_ti = n_tt // n_par

    # Lane-dense layout: merge (H, W) -> H*W in the wrapper (free trailing-dim merge),
    # so kernel vregs are fully populated even when W < 128.
    pred2 = pred_burst.reshape(b, t, c, hw)
    gt2 = ground_truth.reshape(b, c, hw)

    # Image-boundary masks, computed once outside the kernel.
    col = jnp.arange(hw, dtype=jnp.int32)
    mask_h = (col % w != 0).astype(jnp.float32).reshape(1, hw)   # has a left neighbour
    mask_v = (col >= w).astype(jnp.float32).reshape(1, hw)       # has an up neighbour

    kernel = functools.partial(_loss_anneal_kernel, w=w, gradient_l1=gradient_l1)

    partials = pl.pallas_call(
        kernel,
        out_shape=jax.ShapeDtypeStruct((b, n_par, 8, 128), jnp.float32),
        grid_spec=pltpu.PrefetchScalarGridSpec(
            num_scalar_prefetch=0,
            grid=(b, n_par, n_ct, n_ti),
            in_specs=[
                # constant boundary masks (fetched once, reused every step)
                pl.BlockSpec((1, hw), lambda bi, p, ci, ti: (0, 0)),
                pl.BlockSpec((1, hw), lambda bi, p, ci, ti: (0, 0)),
                # pred: one (t_blk, c_blk, H*W) slab per step (batch dim squeezed)
                pl.BlockSpec((None, t_blk, c_blk, hw),
                             lambda bi, p, ci, ti: (bi, p * n_ti + ti, ci, 0)),
                # ground truth: matching (c_blk, H*W) slab, shared across the burst
                pl.BlockSpec((None, c_blk, hw),
                             lambda bi, p, ci, ti: (bi, ci, 0)),
            ],
            # per-(batch, shard) f32 partial sum, written once per group
            out_specs=pl.BlockSpec((None, None, 8, 128),
                                   lambda bi, p, ci, ti: (bi, p, 0, 0)),
            # per-element f32 accumulator, persistent across the sequential axes
            scratch_shapes=[pltpu.VMEM((c_blk, hw), jnp.float32)],
        ),
        compiler_params=pltpu.CompilerParams(
            dimension_semantics=("parallel", "parallel", "arbitrary", "arbitrary"),
            vmem_limit_bytes=vmem_limit_bytes),
    )(mask_h, mask_v, pred2, gt2)

    total = jnp.sum(partials[:, :, 0, 0])
    loss = total / jnp.float32(b * c * h * w * t)

    # Scalar anneal factor (single multiply) applied in the wrapper epilogue.
    if isinstance(global_step, (int, float)):
        scale = beta * (alpha ** global_step)
    else:
        scale = beta * jnp.power(jnp.float32(alpha), global_step)
    return (scale * loss).astype(jnp.float32)


def _loss_anneal_ref(global_step, pred_burst, ground_truth, alpha=0.9998, beta=100.0):
    """Pure-JAX reference matching the PyTorch LossAnneal module."""
    def tensor_gradient(img):
        l = jnp.pad(img, ((0, 0), (0, 0), (0, 0), (1, 0)))[..., :, :-1]
        u = jnp.pad(img, ((0, 0), (0, 0), (1, 0), (0, 0)))[..., :-1, :]
        return jnp.abs(l - img) + jnp.abs(u - img)

    def loss_basic(pred, gt):
        l2 = jnp.mean((pred - gt) ** 2)
        l1 = jnp.mean(jnp.abs(tensor_gradient(pred) - tensor_gradient(gt)))
        return l2 + l1

    t = pred_burst.shape[1]
    loss = 0.0
    for i in range(t):
        loss = loss + loss_basic(pred_burst[:, i], ground_truth)
    loss = loss / t
    return beta * (alpha ** global_step) * loss


if __name__ == "__main__":
    key = jax.random.PRNGKey(0)
    k1, k2 = jax.random.split(key)
    B, T, C, H, W = 2, 8, 4, 16, 16
    pred_burst = jax.random.normal(k1, (B, T, C, H, W), dtype=jnp.float32)
    ground_truth = jax.random.normal(k2, (B, C, H, W), dtype=jnp.float32)
    global_step = 1000

    out = jax.block_until_ready(loss_anneal(global_step, pred_burst, ground_truth))
    ref = _loss_anneal_ref(global_step, pred_burst, ground_truth)

    assert out.shape == (), out.shape
    assert out.dtype == jnp.float32, out.dtype
    assert jnp.allclose(out, ref, rtol=1e-4, atol=1e-4), (float(out), float(ref))

    print("KERNEL_OK")
</pallas_src>

<mosaic_0001>
module attributes {stable_mosaic.version = 11 : i64} {
  func.func @_loss_anneal_kernel(%arg0: i32, %arg1: i32, %arg2: i32, %arg3: i32, %arg4: memref<1x256xf32, #tpu.memory_space<vmem>>, %arg5: memref<1x256xf32, #tpu.memory_space<vmem>>, %arg6: memref<1x8x4x256xf32, #tpu.memory_space<vmem>>, %arg7: memref<1x4x256xf32, #tpu.memory_space<vmem>>, %arg8: memref<1x1x8x128xf32, #tpu.memory_space<vmem>>, %arg9: memref<4x256xf32, #tpu.memory_space<vmem>>) attributes {dimension_semantics = [#tpu.dimension_semantics<parallel>, #tpu.dimension_semantics<parallel>, #tpu.dimension_semantics<arbitrary>, #tpu.dimension_semantics<arbitrary>], iteration_bounds = array<i64: 2, 1, 1, 1>, scalar_prefetch = 0 : i64, scratch_operands = 1 : i64, tpu.core_type = #tpu.core_type<tc>, window_params = [{pipeline_mode = #tpu.pipeline_mode<synchronous>, transform_indices = @transform_0, window_bounds = array<i64: 1, 256>}, {pipeline_mode = #tpu.pipeline_mode<synchronous>, transform_indices = @transform_1, window_bounds = array<i64: 1, 256>}, {transform_indices = @transform_2, window_bounds = array<i64: 1, 8, 4, 256>}, {transform_indices = @transform_3, window_bounds = array<i64: 1, 4, 256>}, {transform_indices = @transform_4, window_bounds = array<i64: 1, 1, 8, 128>}]} {
    %c0_i32 = arith.constant 0 : i32
    %0 = arith.cmpi eq, %arg2, %c0_i32 : i32
    %c0_i32_0 = arith.constant 0 : i32
    %1 = arith.cmpi eq, %arg3, %c0_i32_0 : i32
    %2 = arith.andi %0, %1 : i1
    %3 = arith.extui %2 : i1 to i32
    %c0_i32_1 = arith.constant 0 : i32
    %4 = arith.cmpi ne, %3, %c0_i32_1 : i32
    scf.if %4 {
      %cst = arith.constant 0.000000e+00 : f32
      %26 = vector.broadcast %cst : f32 to vector<4x256xf32>
      %c0_14 = arith.constant 0 : index
      %c0_15 = arith.constant 0 : index
      %27 = vector.load %arg9[%c0_14, %c0_15] : memref<4x256xf32, #tpu.memory_space<vmem>>, vector<4x256xf32>
      tpu.vector_store %arg9[%c0_14, %c0_15], %26 {strides = array<i32>} : memref<4x256xf32, #tpu.memory_space<vmem>>, vector<4x256xf32>,
    } else {
    }
    %c0 = arith.constant 0 : index
    %c0_2 = arith.constant 0 : index
    %5 = vector.load %arg4[%c0, %c0_2] : memref<1x256xf32, #tpu.memory_space<vmem>>, vector<1x256xf32>
    %c0_3 = arith.constant 0 : index
    %c0_4 = arith.constant 0 : index
    %6 = vector.load %arg5[%c0_3, %c0_4] : memref<1x256xf32, #tpu.memory_space<vmem>>, vector<1x256xf32>
    %c0_5 = arith.constant 0 : index
    %c0_6 = arith.constant 0 : index
    %c0_7 = arith.constant 0 : index
    %7 = vector.load %arg7[%c0_5, %c0_6, %c0_7] : memref<1x4x256xf32, #tpu.memory_space<vmem>>, vector<1x4x256xf32>
    %8 = vector.shape_cast %7 : vector<1x4x256xf32> to vector<4x256xf32>
    %c1_i32 = arith.constant 1 : i32
    %9 = tpu.dynamic_rotate %8 by %c1_i32 dim 1 : vector<4x256xf32>, i32 -> vector<4x256xf32>
    %10 = vector.broadcast %5 : vector<1x256xf32> to vector<4x256xf32>
    %11 = arith.mulf %9, %10 : vector<4x256xf32>
    %c16_i32 = arith.constant 16 : i32
    %12 = tpu.dynamic_rotate %8 by %c16_i32 dim 1 : vector<4x256xf32>, i32 -> vector<4x256xf32>
    %13 = vector.broadcast %6 : vector<1x256xf32> to vector<4x256xf32>
    %14 = arith.mulf %12, %13 : vector<4x256xf32>
    %15 = arith.subf %11, %8 : vector<4x256xf32>
    %16 = arith.subf %14, %8 : vector<4x256xf32>
    %17 = math.absf %15 : vector<4x256xf32>
    %18 = math.absf %16 : vector<4x256xf32>
    %19 = arith.addf %17, %18 : vector<4x256xf32>
    %c0_i32_8 = arith.constant 0 : i32
    %c8_i32 = arith.constant 8 : i32
    %20 = arith.addi %c0_i32_8, %c8_i32 : i32
    %c1_i32_9 = arith.constant 1 : i32
    scf.for %arg10 = %c0_i32_8 to %20 step %c1_i32_9  : i32 {
      %c1_i32_14 = arith.constant 1 : i32
      %26 = arith.muli %arg10, %c1_i32_14 : i32
      %c0_i32_15 = arith.constant 0 : i32
      %27 = arith.addi %c0_i32_15, %26 : i32
      %c0_16 = arith.constant 0 : index
      %28 = arith.index_cast %27 : i32 to index
      %c0_17 = arith.constant 0 : index
      %c0_18 = arith.constant 0 : index
      %29 = vector.load %arg6[%c0_16, %28, %c0_17, %c0_18] : memref<1x8x4x256xf32, #tpu.memory_space<vmem>>, vector<1x1x4x256xf32>
      %30 = vector.shape_cast %29 : vector<1x1x4x256xf32> to vector<4x256xf32>
      %c1_i32_19 = arith.constant 1 : i32
      %31 = tpu.dynamic_rotate %30 by %c1_i32_19 dim 1 : vector<4x256xf32>, i32 -> vector<4x256xf32>
      %32 = vector.broadcast %5 : vector<1x256xf32> to vector<4x256xf32>
      %33 = arith.mulf %31, %32 : vector<4x256xf32>
      %c16_i32_20 = arith.constant 16 : i32
      %34 = tpu.dynamic_rotate %30 by %c16_i32_20 dim 1 : vector<4x256xf32>, i32 -> vector<4x256xf32>
      %35 = vector.broadcast %6 : vector<1x256xf32> to vector<4x256xf32>
      %36 = arith.mulf %34, %35 : vector<4x256xf32>
      %37 = arith.subf %33, %30 : vector<4x256xf32>
      %38 = arith.subf %36, %30 : vector<4x256xf32>
      %39 = math.absf %37 : vector<4x256xf32>
      %40 = math.absf %38 : vector<4x256xf32>
      %41 = arith.addf %39, %40 : vector<4x256xf32>
      %42 = arith.subf %30, %8 : vector<4x256xf32>
      %c0_21 = arith.constant 0 : index
      %c0_22 = arith.constant 0 : index
      %43 = vector.load %arg9[%c0_21, %c0_22] : memref<4x256xf32, #tpu.memory_space<vmem>>, vector<4x256xf32>
      %44 = arith.mulf %42, %42 : vector<4x256xf32>
      %45 = arith.subf %41, %19 : vector<4x256xf32>
      %46 = math.absf %45 : vector<4x256xf32>
      %47 = arith.addf %44, %46 : vector<4x256xf32>
      %48 = arith.addf %43, %47 : vector<4x256xf32>
      %c0_23 = arith.constant 0 : index
      %c0_24 = arith.constant 0 : index
      %49 = vector.load %arg9[%c0_23, %c0_24] : memref<4x256xf32, #tpu.memory_space<vmem>>, vector<4x256xf32>
      tpu.vector_store %arg9[%c0_23, %c0_24], %48 {strides = array<i32>} : memref<4x256xf32, #tpu.memory_space<vmem>>, vector<4x256xf32>,
    }
    %c8_i32_10 = arith.constant 8 : i32
    %c0_i32_11 = arith.constant 0 : i32
    %21 = arith.cmpi eq, %arg2, %c0_i32_11 : i32
    %c0_i32_12 = arith.constant 0 : i32
    %22 = arith.cmpi eq, %arg3, %c0_i32_12 : i32
    %23 = arith.andi %21, %22 : i1
    %24 = arith.extui %23 : i1 to i32
    %c0_i32_13 = arith.constant 0 : i32
    %25 = arith.cmpi ne, %24, %c0_i32_13 : i32
    scf.if %25 {
      %cst = arith.constant 0.000000e+00 : f32
      %26 = vector.broadcast %cst : f32 to vector<8x128xf32>
      %c0_14 = arith.constant 0 : index
      %c0_15 = arith.constant 0 : index
      %27 = vector.load %arg9[%c0_14, %c0_15] : memref<4x256xf32, #tpu.memory_space<vmem>>, vector<4x256xf32>
      %28 = vector.shape_cast %27 : vector<4x256xf32> to vector<1x4x256xf32>
      %cst_16 = arith.constant dense<0.000000e+00> : vector<1xf32>
      %29 = vector.multi_reduction <add>, %28, %cst_16 [1, 2] : vector<1x4x256xf32> to vector<1xf32>
      %30 = vector.shape_cast %29 : vector<1xf32> to vector<1x1x1xf32>
      %31 = vector.extract %30[0, 0, 0] : f32 from vector<1x1x1xf32>
      %32 = vector.broadcast %31 : f32 to vector<8x128xf32>
      %33 = arith.addf %26, %32 : vector<8x128xf32>
      %c0_17 = arith.constant 0 : index
      %c0_18 = arith.constant 0 : index
      %c0_19 = arith.constant 0 : index
      %c0_20 = arith.constant 0 : index
      %34 = vector.load %arg8[%c0_17, %c0_18, %c0_19, %c0_20] : memref<1x1x8x128xf32, #tpu.memory_space<vmem>>, vector<1x1x8x128xf32>
      %35 = vector.shape_cast %34 : vector<1x1x8x128xf32> to vector<8x128xf32>
      %36 = vector.shape_cast %33 : vector<8x128xf32> to vector<1x1x8x128xf32>
      tpu.vector_store %arg8[%c0_17, %c0_18, %c0_19, %c0_20], %36 {strides = array<i32>} : memref<1x1x8x128xf32, #tpu.memory_space<vmem>>, vector<1x1x8x128xf32>,
    } else {
    }
    return
  }
  func.func @transform_0(%arg0: i32, %arg1: i32, %arg2: i32, %arg3: i32) -> (i32, i32) {
    %c0_i32 = arith.constant 0 : i32
    %c0_i32_0 = arith.constant 0 : i32
    %c0_i32_1 = arith.constant 0 : i32
    return %c0_i32, %c0_i32_0 : i32, i32
  }
  func.func @transform_1(%arg0: i32, %arg1: i32, %arg2: i32, %arg3: i32) -> (i32, i32) {
    %c0_i32 = arith.constant 0 : i32
    %c0_i32_0 = arith.constant 0 : i32
    %c0_i32_1 = arith.constant 0 : i32
    return %c0_i32, %c0_i32_0 : i32, i32
  }
  func.func @transform_2(%arg0: i32, %arg1: i32, %arg2: i32, %arg3: i32) -> (i32, i32, i32, i32) {
    %c1_i32 = arith.constant 1 : i32
    %0 = arith.muli %arg1, %c1_i32 : i32
    %1 = arith.addi %0, %arg3 : i32
    %c0_i32 = arith.constant 0 : i32
    %c0_i32_0 = arith.constant 0 : i32
    return %arg0, %1, %arg2, %c0_i32 : i32, i32, i32, i32
  }
  func.func @transform_3(%arg0: i32, %arg1: i32, %arg2: i32, %arg3: i32) -> (i32, i32, i32) {
    %c0_i32 = arith.constant 0 : i32
    %c0_i32_0 = arith.constant 0 : i32
    return %arg0, %arg2, %c0_i32 : i32, i32, i32
  }
  func.func @transform_4(%arg0: i32, %arg1: i32, %arg2: i32, %arg3: i32) -> (i32, i32, i32, i32) {
    %c0_i32 = arith.constant 0 : i32
    %c0_i32_0 = arith.constant 0 : i32
    %c0_i32_1 = arith.constant 0 : i32
    return %arg0, %arg1, %c0_i32, %c0_i32_0 : i32, i32, i32, i32
  }
}

</mosaic_0001>

<bundles_post_ra>
// kernel: tpu_custom_call.1
= control target key start
LH: loop header
LB: loop body
LE: loop exit
PB: predicated region body
PF: predicated region fallthrough
CT: control target
= control target key end

     0   :  { %s1258_s0 = inlined_call_operand.hbm [shape: f32[1,256], index: 0, kind: input, shape index: {}]   ;;  %s1259_s1 = inlined_call_operand.vmem [shape: f32[1,256], index: 1, kind: input, shape index: {}]   ;;  %s1260_s2 = inlined_call_operand.hbm [shape: f32[2,8,4,256], index: 2, kind: input, shape index: {}]   ;;  %s1261_s3 = inlined_call_operand.hbm [shape: f32[2,4,256], index: 3, kind: input, shape index: {}]   ;;  %s1262_s4 = inlined_call_operand.hbm [shape: f32[2,1,8,128], index: 4, kind: output, shape index: {}]  }
   0x1   :  { %1272 = sst [smem:[#allocation15_spill]] %s1260_s2 }
   0x2   :  { %9 = vsyncpa [#allocation4], 0 }
   0x3   :  { %10 = vsyncpa [#allocation7], 0 }
   0x4   :  { %12 = vsyncpa [#allocation7 + $0x1], 0 }
   0x5   :  { %13 = vsyncpa [#allocation5], 0 }
   0x6   :  { %15 = vsyncpa [#allocation5 + $0x1], 0  ;;  %s941_s15 = smov 0   ;;  %s943_s16 = smov 0  }
   0x7   :  { %s945_s17 = smov 0   ;;  %s947_s18 = smov 0  }
   0x8   :  { %s949_s19 = smov 0   ;;  %s951_s20 = smov 0  }
   0x9 LB: > { %1273 = sst [smem:[#allocation13_spill]] %s895_s19  ;;  %s47_s21 = sadd.s32 1, %s895_s19  ;;  %s899_s20 = sphi %s951_s20, %s21_s20   ;;  %s895_s19 = sphi %s949_s19, %s1293_s19   ;;  %s891_s18 = sphi %s947_s18, %s1292_s18   ;;  %s887_s17 = sphi %s945_s17, %s1296_s17   ;;  %s883_s16 = sphi %s943_s16, %s1295_s16   ;;  %s879_s15 = sphi %s941_s15, %s1294_s15  }
   0xa   : > { %s102_s22 = sadd.s32 1, %s887_s17  ;;  %p49_p0 = scmp.ge.s32.totalorder %s47_s21, 2 }
   0xb   : > { %p109_p1 = scmp.ne.s32.totalorder %s887_s17, %s883_s16  ;;  %p110_p2 = scmp.eq.s32.totalorder %s899_s20, 0 }
   0xc   : > { %s1298_s21 = smov (%p49_p0, %s47_s21), 0  ;;  %p651_p5 = scmp.lt.s32.totalorder %s899_s20, 2 }
   0xd   : > { %1274 = sst [smem:[#allocation14_spill]] %s1298_s21  ;;  %p111_p4 = por %p110_p2, %p109_p1 }
   0xe   : > { %s95_s23 = ssub.s32 %s895_s19, %s1298_s21  ;;  %s209_s24 = sand.u32 1, %s899_s20  }
   0xf   : > { %p100_p6 = scmp.eq.s32.totalorder %s95_s23, 0  ;;  %s211_s25 = sand.u32 1, %s887_s17  }
  0x10   : > { %s620_s26 = sshll.u32 %s895_s19, 10  ;;  %s603_s28 = sshll.u32 %s211_s25, 6 }
  0x11   : > { %s989_s27 = scalar_select %p100_p6, %s887_s17, %s102_s22  }
  0x12   : > { %s1275_s2 = sld [smem:[#allocation15_spill]]  ;;  %p998_p7 = pnand %p651_p5, %p111_p4 }
  0x13   : > { %s213_s7 = scalar_lea.vmem [#allocation6], %s603_s28  ;;  %s1004_s9 = scalar_lea.sflag [#allocation7], %s209_s24 }
  0x14   : > { %s1276_s6 = scalar_select %p998_p7, 1, 0 }
  0x15   : > { %s226_s8 = sshll.u32 %s213_s7, 4  ;;  %p1266_p9 = pneg %p998_p7  ;;  %s1002_s8 = int_to_ptr.vmem [resolvable:$true] %s226_s8 }
  0x18   : > { %s996_s5 = scalar_lea.hbm %s1275_s2, %s620_s26  ;;  %s726_s13 = scalar_lea.hbm %s1275_s2, 2048 }
  0x19   : > { %s721_s10 = scalar_lea.hbm %s996_s5, 1024  ;;  %p727_p12 = scmp.lt.u32.totalorder %s996_s5, %s1275_s2 }
  0x1a   : > { %p722_p8 = scmp.ne.s32.totalorder %s996_s5, %s721_s10  ;;  %p728_p13 = scmp.lt.u32.totalorder %s726_s13, %s721_s10 }
  0x1b   : > { %p730_p2 = scmp.lt.u32.totalorder %s721_s10, %s996_s5 }
  0x1c   : > { %p724_p10 = pnand %p1266_p9, %p722_p8  ;;  %p729_p0 = por %p728_p13, %p727_p12 }
  0x1e   : > { %p725_p11 = pneg %p724_p10  ;;  %p731_p4 = por %p730_p2, %p729_p0 }
  0x20   : > { %p732_p5 = pnand %p731_p4, %p725_p11 }
  0x22   : > { %735 = shalt.err (!%p732_p5)
}
  0x23   : > { %s736_s23 = scalar_lea.vmem %s1002_s8, 1024  ;;  %s905_s24 = smov [#allocation6]  }
  0x24   : > { %p737_p6 = scmp.ne.s32.totalorder %s1002_s8, %s736_s23  ;;  %s741_s26 = sshll.u32 %s905_s24, 4  ;;  %s742_s26 = int_to_ptr.vmem [resolvable:$false] %s741_s26 }
  0x25   : > { %s743_s28 = scalar_lea.vmem %s742_s26, 2048  ;;  %p744_p3 = scmp.lt.s32.totalorder %s1002_s8, %s742_s26 }
  0x26   : > { %p739_p8 = pnand %p737_p6, %p1266_p9  ;;  %p745_p12 = scmp.lt.s32.totalorder %s743_s28, %s736_s23 }
  0x28   : > { %p740_p10 = pneg %p739_p8  ;;  %p746_p13 = por %p745_p12, %p744_p3 }
  0x2a   : > { %p747_p0 = pnand %p746_p13, %p740_p10 }
  0x2c   : > { %750 = shalt.err (!%p747_p0)
}
  0x2d   : > { %s906_s29 = smov 128   ;;  %s907_s30 = smov 8  }
  0x2e   : > { %642 = dma.hbm_to_vmem [thread:$0]  (!%p998_p7), %s996_s5, 1024, %s1002_s8, %s1004_s9, %s906_s29, %s906_s29, %s907_s30  }
  0x2f   : > { %s1033_s7 = sadd.s32 4294967295, %s899_s20   ;;  %s599_s10 = sadd.s32 4294967294, %s899_s20  }
  0x30   : > { %p115_p3 = scmp.ne.s32.totalorder %s883_s16, %s879_s15  ;;  %p1265_p11 = scmp.eq.s32.totalorder %s1033_s7, 0 }
  0x31   : > { %p169_p2 = scmp.eq.s32.totalorder %s1033_s7, 1  ;;  %p175_p4 = scmp.eq.s32.totalorder %s599_s10, 1 }
  0x32   : > { %p600_p5 = scmp.ge.s32.totalorder %s899_s20, 1  ;;  %p1043_p6 = por %p1265_p11, %p115_p3 }
  0x33   : > { %p1050_p8 = por %p169_p2, %p109_p1  ;;  %p1054_p10 = por %p175_p4, %p115_p3 }
  0x34   : > { %s1277_s11 = scalar_select %p1043_p6, 1, 0 }
  0x35   : > { %s1278_s5 = scalar_select %p1050_p8, 1, 0 }
  0x36   : > { %s1279_s8 = scalar_select %p1054_p10, 1, 0 }
  0x37   : > { %p182_p12 = scmp.lt.s32.totalorder %s899_s20, 3  ;;  %s908_s13 = smov [#allocation3]  }
  0x38   : > { %s195_s14 = sshll.u32 %s908_s13, 4  ;;  %s606_s22 = sshll.u32 %s211_s25, 3  ;;  %s196_s14 = int_to_ptr.vmem [resolvable:$true] %s195_s14 }
  0x39   : > { %p1059_p13 = pnand %p600_p5, %p182_p12  ;;  %s621_s23 = sshll.u32 %s895_s19, 7 }
  0x3a   : > { %s240_s24 = scalar_lea.vmem [#allocation8], %s606_s22  ;;  %s1077_s10 = scalar_lea.hbm %s1261_s3, %s621_s23 }
  0x3b   : > { %s1280_s12 = scalar_select %p1059_p13, 1, 0 }
  0x3c   : > { %p635_p0 = pneg %p1059_p13  ;;  %s250_s26 = sshll.u32 %s240_s24, 4  ;;  %s1079_s26 = int_to_ptr.vmem [resolvable:$true] %s250_s26 }
  0x3d   : > { %s751_s2 = scalar_lea.hbm %s1258_s0, 32 }
  0x3e   : > { %p1070_p1 = pnand %p635_p0, %p1265_p11  ;;  %p752_p3 = scmp.ne.s32.totalorder %s1258_s0, %s751_s2 }
  0x3f   : > { %p758_p12 = scmp.lt.u32.totalorder %s751_s2, %s1258_s0 }
  0x40   : > { %p753_p2 = pneg %p1070_p1 }
  0x42   : > { %p754_p4 = pnand %p753_p2, %p752_p3 }
  0x44   : > { %p755_p5 = pneg %p754_p4 }
  0x46   : > { %p760_p0 = pnand %p758_p12, %p755_p5 }
  0x48   : > { %763 = shalt.err (!%p760_p0)
}
  0x49   : > { %s764_s23 = scalar_lea.vmem %s196_s14, 32  ;;  %p772_p8 = scmp.lt.s32.totalorder %s196_s14, %s196_s14 }
  0x4a   : > { %p765_p11 = scmp.ne.s32.totalorder %s196_s14, %s764_s23  ;;  %p773_p6 = scmp.lt.s32.totalorder %s764_s23, %s764_s23 }
  0x4c   : > { %p767_p9 = pnand %p765_p11, %p753_p2  ;;  %p774_p13 = por %p773_p6, %p772_p8 }
  0x4e   : > { %p768_p10 = pneg %p767_p9 }
  0x50   : > { %p775_p7 = pnand %p774_p13, %p768_p10 }
  0x52   : > { %778 = shalt.err (!%p775_p7)
}
  0x53   : > { %638 = dma.hbm_to_vmem [thread:$0]  (!%p1070_p1), %s1258_s0, 32, %s196_s14, [#allocation4]  }
  0x54   : > { %s779_s2 = scalar_lea.hbm %s1077_s10, 128  ;;  %p1282_p11 = scmp.ne.s32.totalorder %s1276_s6, 0 }
  0x55   : > { %p780_p3 = scmp.ne.s32.totalorder %s1077_s10, %s779_s2  ;;  %s784_s25 = scalar_lea.hbm %s1261_s3, 256 }
  0x56   : > { %p1283_p9 = pneg %p1282_p11  ;;  %p785_p7 = scmp.lt.u32.totalorder %s1077_s10, %s1261_s3 }
  0x57   : > { %p786_p6 = scmp.lt.u32.totalorder %s784_s25, %s779_s2  ;;  %p788_p10 = scmp.lt.u32.totalorder %s779_s2, %s1077_s10 }
  0x58   : > { %p782_p2 = pnand %p780_p3, %p1283_p9 }
  0x59   : > { %p787_p8 = por %p786_p6, %p785_p7 }
  0x5a   : > { %p783_p4 = pneg %p782_p2 }
  0x5b   : > { %p789_p13 = por %p788_p10, %p787_p8 }
  0x5d   : > { %p790_p5 = pnand %p789_p13, %p783_p4 }
  0x5f   : > { %793 = shalt.err (!%p790_p5)
}
  0x60   : > { %s794_s14 = scalar_lea.vmem %s1079_s26, 128  ;;  %p1284_p12 = pmov %p1283_p9 }
  0x61   : > { %p795_p1 = scmp.ne.s32.totalorder %s1079_s26, %s794_s14  ;;  %s909_s22 = smov [#allocation8]  }
  0x62   : > { %s799_s24 = sshll.u32 %s909_s22, 4  ;;  %s800_s24 = int_to_ptr.vmem [resolvable:$false] %s799_s24 }
  0x63   : > { %p797_p0 = pnand %p795_p1, %p1284_p12  ;;  %s801_s23 = scalar_lea.vmem %s800_s24, 256 }
  0x64   : > { %p802_p9 = scmp.lt.s32.totalorder %s1079_s26, %s800_s24  ;;  %p803_p2 = scmp.lt.s32.totalorder %s801_s23, %s794_s14 }
  0x65   : > { %p798_p3 = pneg %p797_p0 }
  0x66   : > { %p804_p7 = por %p803_p2, %p802_p9 }
  0x68   : > { %p805_p6 = pnand %p804_p7, %p798_p3 }
  0x6a   : > { %808 = shalt.err (!%p805_p6)
}
  0x6b   : > { %645 = dma.hbm_to_vmem [thread:$0]  (!%p1282_p11), %s1077_s10, 128, %s1079_s26, %s1004_s9  }
  0x6c   : > { %p1285_p4 = scmp.ne.s32.totalorder %s1280_s12, 0 }
  0x6d   : > { %p1286_p8 = scmp.eq.s32.totalorder (!%p1285_p4), %s1033_s7, 0 }
  0x6e   : > { %259 = sbr.rel (%p1285_p4) target bundleno = 628 (0x274), region = 36 }
  0x75   : > { %866 = dma.done.wait (%p1286_p8), [#allocation4], 32   ;;  %p1287_p10 = pmov %p1286_p8 }
  0x76   : > { %s265_s29 = sand.u32 1, %s1033_s7   ;;  %s1129_s30 = sand.u32 1, %s883_s16  }
  0x77   : > { %868 = vsyncadd (%p1287_p10), [#allocation4], 4294967264  ;;  %s611_s6 = sshll.u32 %s1129_s30, 6  ;;  %s266_s2 = scalar_lea.sflag [#allocation7], %s265_s29 }
  0x78   : > { %s1132_s19 = scalar_lea.vmem [#allocation6], %s611_s6  ;;  %p1288_p11 = scmp.ne.s32.totalorder %s1277_s11, 0 }
  0x7a   : > { %870 = dma.done.wait (%p1288_p11), %s266_s2, 1152  }
  0x7b   : > { %872 = vsyncadd (%p1288_p11), %s266_s2, 4294966144  ;;  %s612_s9 = sshll.u32 %s1129_s30, 3  ;;  %v910_v0 = vmov 0.0   ;;  %s911_s7 = smov 16   ;;  %v327_v3 = vlaneseq  ;;  %v318_v8 = vld [vmem:[%s1259_s1] sm:$0x3] }
  0x7c   : > { %316 = vst [vmem:[#allocation2] sm:$0xff] %v910_v0  ;;  %s278_s12 = scalar_lea.vmem [#allocation8], %s612_s9  ;;  %s912_s26 = smov 1   ;;  %v317_v9 = vld [vmem:[#allocation3] sm:$0x3] }
  0x7d   : > { %v1141_v1 = vld [vmem:[%s278_s12] sm:$0xff]  ;;  %v334_v4 = vshrl.u32 %v327_v3, 7  ;;  %v1147_v5 = vand.u32 127, %v327_v3  ;;  %s1178_s21 = scalar_lea.vmem [#allocation9], %s612_s9  ;;  %s1180_s25 = smov 0  }
  0x7e   : > { %345 = vrot.lane.b32.xlu1 %v1141_v1, %s911_s7  ;;  %323 = vrot.lane.b32.xlu0 %v1141_v1, %s912_s26  ;;  %v321_v2 = vcombine.high %v1141_v1, %v1141_v1 }
  0x7f   : > { %v335_v6 = vsub.s32 0, %v334_v4  ;;  %v339_v7 = vsub.s32 1, %v334_v4  ;;  %vm349_vm0 = vcmp.lt.s32.totalorder %v1147_v5, 16  ;;  %vm329_vm1 = vcmp.lt.s32.totalorder %v1147_v5, 1 }
  0x81   : > { %v1154_v12 = vrot.slane %v318_v8, %v335_v6  ;;  %v1156_v13 = vrot.slane %v318_v8, %v339_v7  ;;  %v1158_v14 = vrot.slane %v317_v9, %v335_v6  ;;  %v1160_v15 = vrot.slane %v317_v9, %v339_v7 }
  0x82   : > { %347 = vrot.lane.b32.xlu1 %v321_v2, %s911_s7  ;;  %325 = vrot.lane.b32.xlu0 %v321_v2, %s912_s26 }
  0xf0   : > { %v346_v10 = vpop.permute.xlu1 %345  ;;  %v324_v11 = vpop.permute.xlu0 %323 }
  0xf4   : > { %v348_v16 = vpop.permute.xlu1 %347  ;;  %v326_v17 = vpop.permute.xlu0 %325 }
  0xf5   : > { %v350_v18 = vsel %vm349_vm0, %v346_v10, %v348_v16  ;;  %v351_v19 = vsel %vm349_vm0, %v348_v16, %v346_v10  ;;  %v330_v20 = vsel %vm329_vm1, %v324_v11, %v326_v17  ;;  %v331_v21 = vsel %vm329_vm1, %v326_v17, %v324_v11 }
  0xf6   : > { %v363_v22 = vmul.f32 %v1154_v12, %v351_v19  ;;  %v364_v23 = vmul.f32 %v1156_v13, %v350_v18  ;;  %v343_v24 = vmul.f32 %v1158_v14, %v331_v21  ;;  %v344_v25 = vmul.f32 %v1160_v15, %v330_v20 }
  0xf8   : > { %v367_v26 = vsub.f32 %v363_v22, %v1141_v1  ;;  %v368_v27 = vsub.f32 %v364_v23, %v321_v2  ;;  %v365_v28 = vsub.f32 %v343_v24, %v1141_v1  ;;  %v366_v29 = vsub.f32 %v344_v25, %v321_v2 }
  0xfa   : > { %v371_v30 = vand.u32 2147483647, %v367_v26  ;;  %v372_v31 = vand.u32 2147483647, %v368_v27  ;;  %v369_v32 = vand.u32 2147483647, %v365_v28 }
  0xfb   : > { %v370_v33 = vand.u32 2147483647, %v366_v29 }
  0xfc   : > { %v373_v34 = vadd.f32 %v371_v30, %v369_v32 }
  0xfd   : > { %v374_v35 = vadd.f32 %v372_v31, %v370_v33 }
  0xfe LB: >> { %s622_s28 = sshll.u32 %s903_s25, 3  ;;  %s913_s14 = smov 16   ;;  %v415_v4 = vld [vmem:[#allocation2] sm:$0xff]  ;;  %s903_s25 = sphi %s1180_s25, %s380_s25  }
  0xff   : >> { %s383_s13 = scalar_lea.vmem %s1132_s19, %s622_s28 [#allocation6]  ;;  %s914_s22 = smov 1  }
 0x100   : >> { %v384_v36 = vld [vmem:[%s383_s13] sm:$0xff]  ;;  %s380_s25 = sadd.s32 1, %s903_s25  }
 0x101   : >> { %396 = vrot.lane.b32.xlu1 %v384_v36, %s913_s14  ;;  %388 = vrot.lane.b32.xlu0 %v384_v36, %s914_s22  ;;  %v386_v37 = vcombine.high %v384_v36, %v384_v36  ;;  %v414_v59 = vsub.f32 %v384_v36, %v1141_v1  ;;  %p377_p13 = scmp.ge.s32.totalorder %s380_s25, 8  }
 0x102   : > { %vm434_vm2 = vcmask (%p377_p13), 1043456   ;;  %s617_s24 = sshll.u32 (%p377_p13), %s891_s18, 7  ;;  %s465_s23 = sshll.u32 (%p377_p13), %s1178_s21, 4  ;;  %s1210_s23 = int_to_ptr.vmem [resolvable:$true] %s465_s23 }
 0x103   : >> { %v416_v0 = vmul.f32 %v414_v59, %v414_v59  ;;  %s1208_s2 = scalar_lea.hbm (%p377_p13), %s1262_s4, %s617_s24  ;;  %s451_s9 = scalar_lea.sflag (%p377_p13), [#allocation5], %s1129_s30 }
 0x104   : > { %s809_s12 = scalar_lea.vmem (%p377_p13), %s1210_s23, 128  ;;  %p1289_p1 = scmp.ne.s32.totalorder (%p377_p13), %s1278_s5, 0 }
 0x105   : >> { %398 = vrot.lane.b32.xlu1 %v386_v37, %s913_s14  ;;  %390 = vrot.lane.b32.xlu0 %v386_v37, %s914_s22  ;;  %p810_p5 = scmp.ne.s32.totalorder (%p377_p13), %s1210_s23, %s809_s12  ;;  %s915_s18 = smov (%p377_p13), [#allocation9]  }
 0x106   : > { %s813_s7 = sshll.u32 (%p377_p13), %s915_s18, 4  ;;  %s814_s7 = int_to_ptr.vmem [resolvable:$false] %s813_s7 }
 0x107   : > { %p811_p12 = pnand (%p377_p13), %p810_p5, %p1289_p1  ;;  %s815_s26 = scalar_lea.vmem (%p377_p13), %s814_s7, 256 }
 0x108   : > { %p816_p3 = scmp.lt.s32.totalorder (%p377_p13), %s1210_s23, %s814_s7  ;;  %p817_p9 = scmp.lt.s32.totalorder (%p377_p13), %s815_s26, %s809_s12 }
 0x109   : > { %p812_p0 = pneg (%p377_p13), %p811_p12 }
 0x10a   : > { %p818_p2 = por (%p377_p13), %p817_p9, %p816_p3 }
 0x10c   : > { %p819_p7 = pnand (%p377_p13), %p818_p2, %p812_p0 }
 0x173   : >> { %v397_v38 = vpop.permute.xlu1 %396  ;;  %v389_v39 = vpop.permute.xlu0 %388 }
 0x177   : >> { %v399_v40 = vpop.permute.xlu1 %398  ;;  %v391_v41 = vpop.permute.xlu0 %390 }
 0x178   : >> { %v400_v42 = vsel %vm349_vm0, %v397_v38, %v399_v40  ;;  %v401_v43 = vsel %vm349_vm0, %v399_v40, %v397_v38  ;;  %v392_v44 = vsel %vm329_vm1, %v389_v39, %v391_v41  ;;  %v393_v45 = vsel %vm329_vm1, %v391_v41, %v389_v39 }
 0x179   : >> { %v402_v46 = vmul.f32 %v401_v43, %v1154_v12  ;;  %v403_v47 = vmul.f32 %v400_v42, %v1156_v13  ;;  %v394_v48 = vmul.f32 %v393_v45, %v1158_v14  ;;  %v395_v49 = vmul.f32 %v392_v44, %v1160_v15 }
 0x17b   : >> { %v406_v50 = vsub.f32 %v402_v46, %v384_v36  ;;  %v407_v51 = vsub.f32 %v403_v47, %v386_v37  ;;  %v404_v52 = vsub.f32 %v394_v48, %v384_v36  ;;  %v405_v53 = vsub.f32 %v395_v49, %v386_v37 }
 0x17d   : >> { %v410_v54 = vand.u32 2147483647, %v406_v50  ;;  %v411_v55 = vand.u32 2147483647, %v407_v51  ;;  %v408_v56 = vand.u32 2147483647, %v404_v52 }
 0x17e   : >> { %v409_v57 = vand.u32 2147483647, %v405_v53 }
 0x17f   : >> { %v412_v58 = vadd.f32 %v410_v54, %v408_v56 }
 0x180   : >> { %v413_v60 = vadd.f32 %v411_v55, %v409_v57 }
 0x181   : >> { %v417_v61 = vsub.f32 %v412_v58, %v373_v34 }
 0x182   : >> { %v418_v62 = vsub.f32 %v413_v60, %v374_v35 }
 0x183   : >> { %v419_v63 = vand.u32 2147483647, %v417_v61 }
 0x184   : >> { %v420_v2 = vand.u32 2147483647, %v418_v62 }
 0x186   : >> { %v423_v3 = vcombine.low %v419_v63, %v420_v2  ;;  %379 = sbr.rel (!%p377_p13) target bundleno = 254 (0xfe), region = 113 }
 0x188   : >> { %v425_v6 = vadd.f32 %v423_v3, %v416_v0 }
 0x18a   : >> { %v426_v7 = vadd.f32 %v425_v6, %v415_v4 }
 0x18c   : >> { %427 = vst [vmem:[#allocation2] sm:$0xff] %v426_v7 }
 0x193   : > { %v430_v8 = vld [vmem:[#allocation2] sm:$0xff] }
 0x194   : > { %v432_v9 = vcombine.high %v430_v8, %v430_v8  ;;  %v435_v10 = vsel %vm434_vm2, %v430_v8, 0.0 }
 0x196   : > { %v436_v11 = vsel %vm434_vm2, %v432_v9, 0.0 }
 0x197   : > { %v437_v16 = vadd.f32 %v436_v11, %v435_v10 }
 0x199   : > { %438 = vadd.xlane.f32.xlu0 %v437_v16 }
 0x226   : > { %v439_v17 = vpop.xlane.xlu0 %438 }
 0x227   : > { %v440_v18 = vrot.slane %v439_v17, 4 }
 0x229   : > { %v441_v19 = vadd.f32 %v440_v18, %v439_v17 }
 0x22b   : > { %v442_v20 = vrot.slane %v441_v19, 2 }
 0x22d   : > { %v443_v21 = vadd.f32 %v442_v20, %v441_v19 }
 0x22f   : > { %v444_v22 = vrot.slane %v443_v21, 1 }
 0x231   : > { %v445_v23 = vadd.f32 %v444_v22, %v443_v21 }
 0x233   : > { %623 = vpush %v445_v23 }
 0x264   : > { %s624_s19 = spop %623 }
 0x265   : > { %v447_v1 = vstv %s624_s19 }
 0x266   : > { %449 = vst [vmem:[%s1178_s21] sm:$0xff] %v447_v1 }
 0x267   : > { %822 = shalt.err (!%p819_p7)
}
 0x268   : > { %s823_s30 = scalar_lea.hbm %s1208_s2, 128  ;;  %s827_s21 = scalar_lea.hbm %s1262_s4, 256 }
 0x269   : > { %p824_p6 = scmp.ne.s32.totalorder %s1208_s2, %s823_s30  ;;  %p828_p10 = scmp.lt.u32.totalorder %s1208_s2, %s1262_s4 }
 0x26a   : > { %p829_p11 = scmp.lt.u32.totalorder %s827_s21, %s823_s30  ;;  %p831_p5 = scmp.lt.u32.totalorder %s823_s30, %s1208_s2 }
 0x26b   : > { %p825_p4 = pnand %p824_p6, %p1289_p1 }
 0x26c   : > { %p830_p13 = por %p829_p11, %p828_p10 }
 0x26d   : > { %p826_p8 = pneg %p825_p4 }
 0x26e   : > { %p832_p12 = por %p831_p5, %p830_p13 }
 0x270   : > { %p833_p0 = pnand %p832_p12, %p826_p8 }
 0x272   : > { %836 = shalt.err (!%p833_p0)
}
 0x273   : > { %633 = dma.vmem_to_hbm [thread:$0]  (%p1289_p1), %s1210_s23, 128, %s1208_s2, %s451_s9  }
 0x274 PF: > { %s477_s13 = sand.u32 1, %s879_s15   ;;  %p1290_p3 = scmp.ne.s32.totalorder %s1279_s8, 0 }
 0x275   : > { %p1291_p9 = scmp.ge.s32.totalorder %s899_s20, 2  ;;  %s478_s14 = scalar_lea.sflag [#allocation5], %s477_s13 }
 0x277   : > { %p647_p2 = pnand %p1291_p9, %p1290_p3 }
 0x279   : > { %874 = dma.done.wait (!%p647_p2), %s478_s14, 128  }
 0x27a   : > { %876 = vsyncadd (!%p647_p2), %s478_s14, 4294967168  ;;  %s21_s20 = sadd.s32 1, %s899_s20   ;;  %s1292_s18 = sld [smem:[#allocation13_spill]] }
 0x27b   : > { %p18_p7 = scmp.ge.s32.totalorder %s21_s20, 4   ;;  %s1293_s19 = sld [smem:[#allocation14_spill]] }
 0x27c   : > { %s1294_s15 = smov %s883_s16  ;;  %s1295_s16 = smov %s887_s17 }
 0x27d   : > { %s1296_s17 = smov %s989_s27  ;;  %20 = sbr.rel (!%p18_p7) target bundleno = 9 (0x9), region = 124 }
 0x284   :  { %483 = vsyncpa [#allocation4], 1 }
 0x285   :  { %485 = vsyncpa [#allocation4 + $0x1], 1 }
 0x286   :  { %486 = vsyncpa [#allocation7], 1 }
 0x287   :  { %488 = vsyncpa [#allocation7 + $0x1], 1 }
 0x288   :  { %489 = vsyncpa [#allocation5], 1 }
 0x289   :  { %491 = vsyncpa [#allocation5 + $0x1], 1 }

</bundles_post_ra>
